<compile_context>
chip_gen: v7x
topology: tpu7x:2x2x1
jax: 0.10.0
libtpu: 0.0.40
codegen_flags: <defaults>
</compile_context>

<pallas_src>
import jax
import jax.numpy as jnp
from jax.experimental import pallas as pl
from jax.experimental.pallas import tpu as pltpu  # noqa: F401  (TPU backend)

IN_FEATURES = 2
HIDDEN = 50
NUM_ACTIONS = 10       # use_case_config.num_actions
LANES = 128            # lane-dense padded width
K_PAD = 64             # fc2 contraction width == total slab rows (multiple of 8)
BIAS_LANE = HIDDEN     # lane 50 of h carries the constant 1.0 for the b2 fold
W1_ROW0 = 56           # slab row holding W1[0, :]
W1_ROW1 = 57           # slab row holding W1[1, :]
B1_ROW = 58            # slab row holding b1 (+ the 1.0 at BIAS_LANE)


def _mlp_kernel(x_ref, p_ref, o_ref):
    x = x_ref[...]                               # (B, 2) f32

    # --- static sublane views into the parameter slab (no extra DMAs) ---
    w1_r0 = p_ref[W1_ROW0:W1_ROW0 + 1, :]        # (1, 128)  W1 row for feature 0
    w1_r1 = p_ref[W1_ROW1:W1_ROW1 + 1, :]        # (1, 128)  W1 row for feature 1
    b1    = p_ref[B1_ROW:B1_ROW + 1, :]          # (1, 128)  b1, lane 50 == 1.0

    # --- fc1 + ReLU on the VPU: K=2 would waste an MXU pass; two broadcast FMAs ---
    h = x[:, 0:1] * w1_r0 + x[:, 1:2] * w1_r1 + b1   # (B, 128)
    h = jnp.maximum(h, 0.0)                          # pad lanes stay 0; lane 50 == 1

    # --- fc2 on the MXU, b2 folded into slab row 50 via the constant-1 lane ---
    # Contraction over lanes 0..63 of h: lanes 51..63 are exactly 0, so slab rows
    # 51..63 (zeros / W1 / b1) contribute nothing; lane 50 * row 50 adds b2.
    out = jnp.dot(h[:, :K_PAD], p_ref[...],
                  preferred_element_type=jnp.float32)  # (B, 128)
    o_ref[...] = out.astype(o_ref.dtype)


def pack_params(w1, b1, w2, b2):
    """Pack all parameters ONCE into a lane-dense (64, 128) f32 slab.

    rows  0..49 : W2 (50, 10) zero-padded along lanes
    row      50 : b2 (folded fc2 bias; paired with the constant-1 lane of h)
    rows 51..55 : zero
    rows 56..57 : W1 stored as (2, 50), zero-padded along lanes
    row      58 : b1 (50), plus 1.0 at lane 50 (drives the bias fold)
    rows 59..63 : zero
    """
    slab = jnp.zeros((K_PAD, LANES), jnp.float32)
    slab = slab.at[0:HIDDEN, 0:NUM_ACTIONS].set(jnp.asarray(w2, jnp.float32))
    slab = slab.at[HIDDEN, 0:NUM_ACTIONS].set(jnp.asarray(b2, jnp.float32).reshape(-1))
    slab = slab.at[W1_ROW0:W1_ROW0 + IN_FEATURES, 0:HIDDEN].set(
        jnp.asarray(w1, jnp.float32))
    slab = slab.at[B1_ROW, 0:HIDDEN].set(jnp.asarray(b1, jnp.float32).reshape(-1))
    slab = slab.at[B1_ROW, BIAS_LANE].set(1.0)
    return slab


@jax.jit
def nn_use_case_forward(x, slab):
    """Pallas forward for NN_use_case given a pre-packed parameter slab."""
    x = x.astype(jnp.float32)                    # mirrors torch.tensor(x).float()
    B = x.shape[0]

    full = lambda shape: pl.BlockSpec(shape, lambda: tuple(0 for _ in shape))
    out_pad = pl.pallas_call(
        _mlp_kernel,
        out_shape=jax.ShapeDtypeStruct((B, LANES), jnp.float32),
        grid=(),
        in_specs=[
            full(x.shape),           # (B, 2)
            full(slab.shape),        # (64, 128) single parameter DMA
        ],
        out_specs=full((B, LANES)),  # lane-dense output -> unmasked stores
    )(x, slab)
    return out_pad[:, :NUM_ACTIONS]


def init_params(key):
    """Matches nn.Linear default init: uniform(-1/sqrt(fan_in), 1/sqrt(fan_in))."""
    k1, k2, k3, k4 = jax.random.split(key, 4)
    bound1 = 1.0 / jnp.sqrt(jnp.float32(IN_FEATURES))
    bound2 = 1.0 / jnp.sqrt(jnp.float32(HIDDEN))
    # stored as (in, out) = transpose of PyTorch's (out, in)
    w1 = jax.random.uniform(k1, (IN_FEATURES, HIDDEN), jnp.float32, -bound1, bound1)
    b1 = jax.random.uniform(k2, (1, HIDDEN), jnp.float32, -bound1, bound1)
    w2 = jax.random.uniform(k3, (HIDDEN, NUM_ACTIONS), jnp.float32, -bound2, bound2)
    b2 = jax.random.uniform(k4, (1, NUM_ACTIONS), jnp.float32, -bound2, bound2)
    return w1, b1, w2, b2


def reference_forward(x, w1, b1, w2, b2):
    h = jnp.maximum(x.astype(jnp.float32) @ w1 + b1, 0.0)
    return h @ w2 + b2


if __name__ == "__main__":
    key = jax.random.PRNGKey(0)
    kx, kp = jax.random.split(key)

    batch_size = 32  # use_case_config.batch_size
    # states are (biomass, nitrate)-like 2-vectors; any float values work
    x = jax.random.uniform(kx, (batch_size, IN_FEATURES), jnp.float32, 0.0, 150.0)

    w1, b1, w2, b2 = init_params(kp)

    # Pack parameters ONCE at init (hoisted out of the per-call path).
    slab = jax.block_until_ready(pack_params(w1, b1, w2, b2))

    out = nn_use_case_forward(x, slab)
    out = jax.block_until_ready(out)

    ref = reference_forward(x, w1, b1, w2, b2)
    assert out.shape == (batch_size, NUM_ACTIONS)
    assert jnp.allclose(out, ref, atol=1e-4, rtol=1e-4), "mismatch vs reference"

    print("KERNEL_OK")
</pallas_src>

<mosaic_0001>
module attributes {stable_mosaic.version = 11 : i64} {
  func.func @_mlp_kernel(%arg0: memref<32x2xf32, #tpu.memory_space<vmem>>, %arg1: memref<64x128xf32, #tpu.memory_space<vmem>>, %arg2: memref<32x128xf32, #tpu.memory_space<vmem>>) attributes {dimension_semantics = [], scalar_prefetch = 0 : i64, scratch_operands = 0 : i64, tpu.core_type = #tpu.core_type<tc>} {
    %c0 = arith.constant 0 : index
    %c0_0 = arith.constant 0 : index
    %0 = vector.load %arg0[%c0, %c0_0] : memref<32x2xf32, #tpu.memory_space<vmem>>, vector<32x2xf32>
    %c56 = arith.constant 56 : index
    %c0_1 = arith.constant 0 : index
    %1 = vector.load %arg1[%c56, %c0_1] : memref<64x128xf32, #tpu.memory_space<vmem>>, vector<1x128xf32>
    %c57 = arith.constant 57 : index
    %c0_2 = arith.constant 0 : index
    %2 = vector.load %arg1[%c57, %c0_2] : memref<64x128xf32, #tpu.memory_space<vmem>>, vector<1x128xf32>
    %c58 = arith.constant 58 : index
    %c0_3 = arith.constant 0 : index
    %3 = vector.load %arg1[%c58, %c0_3] : memref<64x128xf32, #tpu.memory_space<vmem>>, vector<1x128xf32>
    %4 = vector.extract_strided_slice %0 {offsets = [0, 0], sizes = [32, 1], strides = [1, 1]} : vector<32x2xf32> to vector<32x1xf32>
    %5 = vector.broadcast %4 : vector<32x1xf32> to vector<32x128xf32>
    %6 = vector.broadcast %1 : vector<1x128xf32> to vector<32x128xf32>
    %7 = arith.mulf %5, %6 : vector<32x128xf32>
    %8 = vector.extract_strided_slice %0 {offsets = [0, 1], sizes = [32, 1], strides = [1, 1]} : vector<32x2xf32> to vector<32x1xf32>
    %9 = vector.broadcast %8 : vector<32x1xf32> to vector<32x128xf32>
    %10 = vector.broadcast %2 : vector<1x128xf32> to vector<32x128xf32>
    %11 = arith.mulf %9, %10 : vector<32x128xf32>
    %12 = arith.addf %7, %11 : vector<32x128xf32>
    %13 = vector.broadcast %3 : vector<1x128xf32> to vector<32x128xf32>
    %14 = arith.addf %12, %13 : vector<32x128xf32>
    %cst = arith.constant 0.000000e+00 : f32
    %15 = vector.broadcast %cst : f32 to vector<32x128xf32>
    %16 = arith.maximumf %14, %15 : vector<32x128xf32>
    %17 = vector.extract_strided_slice %16 {offsets = [0, 0], sizes = [32, 64], strides = [1, 1]} : vector<32x128xf32> to vector<32x64xf32>
    %c0_4 = arith.constant 0 : index
    %c0_5 = arith.constant 0 : index
    %18 = vector.load %arg1[%c0_4, %c0_5] : memref<64x128xf32, #tpu.memory_space<vmem>>, vector<64x128xf32>
    %cst_6 = arith.constant dense<0.000000e+00> : vector<32x128xf32>
    %19 = tpu.matmul %17, %18, %cst_6 {dimension_numbers = #tpu.dot_dimension_numbers<[1], [0], [0], [1], [0, 0, 1, 1], [], []>} : vector<32x64xf32>, vector<64x128xf32>, vector<32x128xf32> -> vector<32x128xf32>
    %c0_7 = arith.constant 0 : index
    %c0_8 = arith.constant 0 : index
    %20 = vector.load %arg2[%c0_7, %c0_8] : memref<32x128xf32, #tpu.memory_space<vmem>>, vector<32x128xf32>
    tpu.vector_store %arg2[%c0_7, %c0_8], %19 {strides = array<i32>} : memref<32x128xf32, #tpu.memory_space<vmem>>, vector<32x128xf32>,
    return
  }
}

</mosaic_0001>

<bundles_post_ra>
// kernel: nn_use_case_forward.1
= control target key start
LH: loop header
LB: loop body
LE: loop exit
PB: predicated region body
PF: predicated region fallthrough
CT: control target
= control target key end

     0   :  { %7 = vsyncpa [#allocation3], 0  ;;  %s314_s9 = smov [#allocation2]   ;;  %s374_s0 = inlined_call_operand.vmem [shape: f32[32,2], index: 0, kind: input, shape index: {}]   ;;  %s375_s1 = inlined_call_operand.hbm [shape: f32[64,128], index: 1, kind: input, shape index: {}]   ;;  %s376_s2 = inlined_call_operand.vmem [shape: f32[32,128], index: 2, kind: output, shape index: {}]  }
   0x1   :  { %s15_s10 = sshll.u32 %s314_s9, 4  ;;  %s290_s13 = scalar_lea.hbm %s375_s1, 1024  ;;  %s16_s10 = int_to_ptr.vmem [resolvable:$true] %s15_s10 }
   0x2   :  { %p291_p0 = scmp.ne.s32.totalorder %s375_s1, %s290_s13  ;;  %p294_p1 = scmp.lt.u32.totalorder %s290_s13, %s375_s1 }
   0x4   :  { %p296_p2 = pnand %p294_p1, %p291_p0 }
   0x6   :  { %299 = shalt.err (!%p296_p2)
}
   0x7   :  { %s300_s18 = scalar_lea.vmem %s16_s10, 1024  ;;  %p305_p4 = scmp.lt.s32.totalorder %s16_s10, %s16_s10 }
   0x8   :  { %p301_p3 = scmp.ne.s32.totalorder %s16_s10, %s300_s18  ;;  %p306_p5 = scmp.lt.s32.totalorder %s300_s18, %s300_s18 }
   0xa   :  { %p307_p6 = por %p306_p5, %p305_p4 }
   0xc   :  { %p308_p7 = pnand %p307_p6, %p301_p3 }
   0xe   :  { %311 = shalt.err (!%p308_p7)
}
   0xf   :  { %s315_s19 = smov 128   ;;  %s316_s20 = smov 8  }
  0x10   :  { %21 = dma.hbm_to_vmem [thread:$0]  %s375_s1, 1024, %s16_s10, [#allocation3], %s315_s19, %s315_s19, %s316_s20  }
  0x11   :  { %312 = dma.done.wait [#allocation3], 1024  }
  0x12   :  { %313 = vsyncadd [#allocation3], 4294966272  ;;  %v317_v0 = vmov 1   ;;  %v318_v1 = vmov 0   ;;  %v25_v2 = vld [vmem:[%s374_s0] sm:$0xff]  ;;  %v27_v3 = vld [vmem:[%s374_s0 + $0x10] sm:$0xff] }
  0x13   :  { %286 = vset.pattern.permute.xlu1 %v317_v0  ;;  %285 = vset.pattern.permute.xlu0 %v318_v1  ;;  %v100_v4 = vld [vmem:[#allocation2] sm:$0xff]  ;;  %v101_v5 = vld [vmem:[#allocation2 + $0x8] sm:$0xff]  ;;  %v28_v8 = vld [vmem:[%s374_s0 + $0x18] sm:$0xff]  ;;  %vm108_vm0 = vcmask 523264  }
  0x14   :  { %61 = vperm.xlu1 %286, %v25_v2   ;;  %34 = vperm.xlu0 %285, %v25_v2   ;;  %v256_v6 = vpack.c.bf16 %v101_v5, %v100_v4  ;;  %v26_v7 = vld [vmem:[%s374_s0 + $0x8] sm:$0xff]  ;;  %v102_v9 = vld [vmem:[#allocation2 + $0x10] sm:$0xff]  ;;  %v103_v10 = vld [vmem:[#allocation2 + $0x18] sm:$0xff] }
  0x15   :  { %v260_v11 = vpack.c.bf16 %v103_v10, %v102_v9  ;;  %v104_v12 = vld [vmem:[#allocation2 + $0x20] sm:$0xff]  ;;  %v105_v13 = vld [vmem:[#allocation2 + $0x28] sm:$0xff]  ;;  %v106_v15 = vld [vmem:[#allocation2 + $0x30] sm:$0xff] }
  0x16   :  { %257 = vmatprep.subr.bf16.mxu0 %v256_v6  ;;  %272 = vmatprep.subr.bf16.mxu1 %v256_v6  ;;  %v264_v14 = vpack.c.bf16 %v105_v13, %v104_v12  ;;  %v107_v16 = vld [vmem:[#allocation2 + $0x38] sm:$0xff] }
  0x17   :  { %259 = vmatpush3.bf16.msra.mxu0 %v256_v6  ;;  %276 = vmatpush3.bf16.msra.mxu1 %v256_v6  ;;  %v268_v17 = vpack.c.bf16 %v107_v16, %v106_v15  ;;  %v216_v18 = vld [vmem:[#allocation2 + $0x39] ss:$0 sm:$0xff]  ;;  %v215_v19 = vld [vmem:[#allocation2 + $0x38] ss:$0 sm:$0xff]  ;;  %v217_v24 = vld [vmem:[#allocation2 + $0x3a] ss:$0 sm:$0xff] }
  0x18   :  { %69 = vperm.xlu1 %286, %v27_v3   ;;  %44 = vperm.xlu0 %285, %v27_v3  }
  0x19   :  { %261 = vmatprep.subr.bf16.mxu0 %v260_v11  ;;  %273 = vmatprep.subr.bf16.mxu1 %v260_v11 }
  0x1b   :  { %263 = vmatpush3.bf16.msra.mxu0 %v260_v11  ;;  %277 = vmatpush3.bf16.msra.mxu1 %v260_v11 }
  0x1c   :  { %287 = vset.pattern.permute.xlu1 %v318_v1  ;;  %39 = vperm.xlu0 %285, %v26_v7  }
  0x1d   :  { %49 = vperm.xlu1 %287, %v28_v8   ;;  %265 = vmatprep.subr.bf16.mxu0 %v264_v14 }
  0x1e   :  { %274 = vmatprep.subr.bf16.mxu1 %v264_v14 }
  0x1f   :  { %267 = vmatpush3.bf16.msra.mxu0 %v264_v14  ;;  %278 = vmatpush3.bf16.msra.mxu1 %v264_v14 }
  0x20   :  { %288 = vset.pattern.permute.xlu0 %v317_v0  ;;  %269 = vmatprep.subr.bf16.mxu0 %v268_v17 }
  0x21   :  { %289 = vset.pattern.permute.xlu1 %v317_v0  ;;  %65 = vperm.xlu0 %288, %v26_v7  }
  0x22   :  { %73 = vperm.xlu1 %289, %v28_v8   ;;  %275 = vmatprep.subr.bf16.mxu1 %v268_v17 }
  0x23   :  { %271 = vmatpush3.bf16.msra.mxu0 %v268_v17  ;;  %279 = vmatpush3.bf16.msra.mxu1 %v268_v17 }
  0x93   :  { %v62_v20 = vpop.permute.xlu1 %61  ;;  %v35_v21 = vpop.permute.xlu0 %34 }
  0x94   :  { %v80_v22 = vmul.f32 %v216_v18, %v62_v20  ;;  %v56_v23 = vmul.f32 %v215_v19, %v35_v21 }
  0x96   :  { %v84_v25 = vadd.f32 %v80_v22, %v56_v23 }
  0x97   :  { %v70_v26 = vpop.permute.xlu1 %69  ;;  %v45_v27 = vpop.permute.xlu0 %44 }
  0x98   :  { %v82_v28 = vmul.f32 %v216_v18, %v70_v26  ;;  %v58_v29 = vmul.f32 %v215_v19, %v45_v27  ;;  %v92_v30 = vadd.f32 %v217_v24, %v84_v25 }
  0x9a   :  { %v86_v31 = vadd.f32 %v82_v28, %v58_v29  ;;  %v96_v32 = vmax.f32 %v92_v30, 0.0 }
  0x9b   :  { %v40_v33 = vpop.permute.xlu0 %39 }
  0x9c   :  { %v50_v34 = vpop.permute.xlu1 %49  ;;  %250 = vmatprep.mubr.msk.f32.mxu0 %vm108_vm0, %v96_v32  ;;  %v94_v35 = vadd.f32 %v217_v24, %v86_v31  ;;  %v57_v38 = vmul.f32 %v215_v19, %v40_v33 }
  0x9d   :  { %v59_v41 = vmul.f32 %v215_v19, %v50_v34 }
  0x9e   :  { %v98_v36 = vmax.f32 %v94_v35, 0.0 }
  0xa0   :  { %253 = vmatprep.mubr.msk.f32.mxu1 %vm108_vm0, %v98_v36  ;;  %v66_v37 = vpop.permute.xlu0 %65 }
  0xa1   :  { %v81_v39 = vmul.f32 %v216_v18, %v66_v37  ;;  %v74_v40 = vpop.permute.xlu1 %73 }
  0xa2   :  { %v83_v42 = vmul.f32 %v216_v18, %v74_v40 }
  0xa3   :  { %v85_v43 = vadd.f32 %v81_v39, %v57_v38 }
  0xa4   :  { %v87_v44 = vadd.f32 %v83_v42, %v59_v41 }
  0xa5   :  { %v93_v45 = vadd.f32 %v217_v24, %v85_v43 }
  0xa6   :  { %v95_v46 = vadd.f32 %v217_v24, %v87_v44 }
  0xa7   :  { %v97_v47 = vmax.f32 %v93_v45, 0.0 }
  0xa8   :  { %v99_v48 = vmax.f32 %v95_v46, 0.0 }
  0xa9   :  { %251 = vmatmul.mubr.msk.f32.vlgmr.msra.gmra.mrb[0].mxu0 %vm108_vm0, %v97_v47 }
  0xaa   :  { %254 = vmatmul.mubr.msk.f32.vlgmr.msra.gmra.mrb[0].mxu1 %vm108_vm0, %v99_v48 }
 0x17c   :  { %v252_v49 = vpop.f32.mrb[0].mxu0 }
 0x17d   :  { %207 = vst [vmem:[%s376_s2 + $0x8] sm:$0xff] %v252_v49  ;;  %v187_v50 = vpop.f32.mrb[1].mxu0  ;;  %v255_v51 = vpop.f32.mrb[0].mxu1 }
 0x17e   :  { %206 = vst [vmem:[%s376_s2] sm:$0xff] %v187_v50  ;;  %209 = vst [vmem:[%s376_s2 + $0x18] sm:$0xff] %v255_v51  ;;  %v197_v52 = vpop.f32.mrb[1].mxu1 }
 0x17f   :  { %208 = vst [vmem:[%s376_s2 + $0x10] sm:$0xff] %v197_v52 }
 0x180   :  { %214 = vsyncpa [#allocation3], 1 }

</bundles_post_ra>
